<compile_context>
chip_gen: v6e
topology: v6e:2x2x1
jax: 0.10.0
libtpu: 0.0.40
codegen_flags: <defaults>
</compile_context>

<pallas_src>
import jax
import jax.numpy as jnp
import numpy as np
from jax.experimental import pallas as pl
from jax.experimental.pallas import tpu as pltpu  # noqa: F401  (TPU backend namespace)

B, S, D = 2, 8, 32          # batch, max_seq_length, dim
V = 128                     # vocab_size
P = 64                      # max_position_embeddings (S <= P)
PAD_ID = 0                  # pad_token_id
EPS = 1e-12                 # LayerNorm eps
BS = B * S


def create_sinusoidal_embeddings(n_pos, dim):
    """NumPy port of the PyTorch init helper (init-time only, not part of forward)."""
    position_enc = np.array(
        [[pos / np.power(10000, 2 * (j // 2) / dim) for j in range(dim)] for pos in range(n_pos)]
    )
    out = np.zeros((n_pos, dim), dtype=np.float32)
    out[:, 0::2] = np.sin(position_enc[:, 0::2])
    out[:, 1::2] = np.cos(position_enc[:, 1::2])
    return jnp.asarray(out)


def embeddings_kernel(ids_ref, word_ref, pos_ref, gb_ref, out_ref):
    # ids_ref: (BS, 1) int32 token ids; word_ref: (V, D); pos_ref: (P, D); gb_ref: (2, D)
    ids = ids_ref[...]                                               # (BS, 1)
    col = jax.lax.broadcasted_iota(jnp.int32, (BS, V), 1)            # (BS, V)
    sel = (col == ids).astype(jnp.float32)                           # one-hot word selector
    # Word-embedding gather fused into a single K=V=128 MXU contraction (exact: one-hot, f32 acc).
    word = jnp.dot(sel, word_ref[...], preferred_element_type=jnp.float32)   # (BS, D)

    # Position embeddings: rows 0..S-1 (position_ids = arange(S)), broadcast over batch.
    pos = pos_ref[0:S, :]                                            # (S, D), static slice
    emb = word.reshape(B, S, D) + pos[None, :, :]                    # (B, S, D)

    # LayerNorm over dim (eps=1e-12), affine with gamma/beta; dropout p=0 => identity.
    mu = jnp.mean(emb, axis=-1, keepdims=True)
    var = jnp.mean(jnp.square(emb - mu), axis=-1, keepdims=True)
    norm = (emb - mu) * jax.lax.rsqrt(var + jnp.float32(EPS))
    gb = gb_ref[...]                                                 # row 0 = gamma, row 1 = beta
    out_ref[...] = norm * gb[0:1, :] + gb[1:2, :]


@jax.jit
def distilbert_embeddings(input_ids, word_table, pos_table, gamma_beta):
    # Only per-call prep: flatten token ids to a (BS, 1) column (tiny, layout-trivial reshape).
    ids2d = input_ids.astype(jnp.int32).reshape(BS, 1)
    return pl.pallas_call(
        embeddings_kernel,
        out_shape=jax.ShapeDtypeStruct((B, S, D), jnp.float32),
        # No grid: single invocation, nothing to pipeline at these shapes.
        in_specs=[
            pl.BlockSpec((BS, 1), lambda: (0, 0)),     # token ids
            pl.BlockSpec((V, D), lambda: (0, 0)),      # word embedding table (resident)
            pl.BlockSpec((P, D), lambda: (0, 0)),      # position embedding table (resident)
            pl.BlockSpec((2, D), lambda: (0, 0)),      # packed LayerNorm gamma/beta
        ],
        out_specs=pl.BlockSpec((B, S, D), lambda: (0, 0, 0)),
    )(ids2d, word_table, pos_table, gamma_beta)


def reference(input_ids, word_table, pos_table, gamma, beta):
    we = word_table[input_ids]                        # (B, S, D)
    pe = pos_table[jnp.arange(S)][None, :, :]         # (1, S, D)
    emb = we + pe
    mu = jnp.mean(emb, axis=-1, keepdims=True)
    var = jnp.mean((emb - mu) ** 2, axis=-1, keepdims=True)
    return (emb - mu) / jnp.sqrt(var + EPS) * gamma.reshape(1, 1, D) + beta.reshape(1, 1, D)


if __name__ == "__main__":
    key = jax.random.PRNGKey(0)
    k_ids, k_word, k_g, k_b = jax.random.split(key, 4)

    input_ids = jax.random.randint(k_ids, (B, S), 1, V, dtype=jnp.int32)
    input_ids = input_ids.at[1, 6:].set(PAD_ID)       # include some padding tokens

    word_table = 0.02 * jax.random.normal(k_word, (V, D), dtype=jnp.float32)
    word_table = word_table.at[PAD_ID].set(0.0)       # nn.Embedding(padding_idx=...) zero row
    pos_table = create_sinusoidal_embeddings(P, D)    # config.sinusoidal_pos_embds = True
    gamma = 1.0 + 0.1 * jax.random.normal(k_g, (D,), dtype=jnp.float32)
    beta = 0.1 * jax.random.normal(k_b, (D,), dtype=jnp.float32)
    # Init-time parameter packing (not a per-call op): one (2, D) slab for LayerNorm affine.
    gamma_beta = jnp.stack([gamma, beta], axis=0)

    out = distilbert_embeddings(input_ids, word_table, pos_table, gamma_beta)
    jax.block_until_ready(out)

    ref = reference(input_ids, word_table, pos_table, gamma, beta)
    np.testing.assert_allclose(np.asarray(out), np.asarray(ref), rtol=1e-4, atol=1e-4)
    print("KERNEL_OK")
</pallas_src>

<mosaic_0001>
module attributes {stable_mosaic.version = 11 : i64} {
  func.func @embeddings_kernel(%arg0: memref<16x1xi32, #tpu.memory_space<vmem>>, %arg1: memref<128x32xf32, #tpu.memory_space<vmem>>, %arg2: memref<64x32xf32, #tpu.memory_space<vmem>>, %arg3: memref<2x32xf32, #tpu.memory_space<vmem>>, %arg4: memref<2x8x32xf32, #tpu.memory_space<vmem>>) attributes {dimension_semantics = [], scalar_prefetch = 0 : i64, scratch_operands = 0 : i64, tpu.core_type = #tpu.core_type<tc>} {
    %c0 = arith.constant 0 : index
    %c0_0 = arith.constant 0 : index
    %0 = vector.load %arg0[%c0, %c0_0] : memref<16x1xi32, #tpu.memory_space<vmem>>, vector<16x1xi32>
    %1 = tpu.iota {dimensions = array<i32: 1>} : vector<16x128xi32>
    %2 = vector.broadcast %0 : vector<16x1xi32> to vector<16x128xi32>
    %3 = arith.cmpi eq, %1, %2 : vector<16x128xi32>
    %4 = arith.extui %3 : vector<16x128xi1> to vector<16x128xi32>
    %5 = arith.sitofp %4 : vector<16x128xi32> to vector<16x128xf32>
    %c0_1 = arith.constant 0 : index
    %c0_2 = arith.constant 0 : index
    %6 = vector.load %arg1[%c0_1, %c0_2] : memref<128x32xf32, #tpu.memory_space<vmem>>, vector<128x32xf32>
    %cst = arith.constant dense<0.000000e+00> : vector<16x32xf32>
    %7 = tpu.matmul %5, %6, %cst {dimension_numbers = #tpu.dot_dimension_numbers<[1], [0], [0], [1], [0, 0, 1, 1], [], []>} : vector<16x128xf32>, vector<128x32xf32>, vector<16x32xf32> -> vector<16x32xf32>
    %c0_3 = arith.constant 0 : index
    %c0_4 = arith.constant 0 : index
    %8 = vector.load %arg2[%c0_3, %c0_4] : memref<64x32xf32, #tpu.memory_space<vmem>>, vector<8x32xf32>
    %9 = vector.shape_cast %7 : vector<16x32xf32> to vector<2x8x32xf32>
    %10 = vector.shape_cast %8 : vector<8x32xf32> to vector<1x8x32xf32>
    %11 = vector.broadcast %10 : vector<1x8x32xf32> to vector<2x8x32xf32>
    %12 = arith.addf %9, %11 : vector<2x8x32xf32>
    %cst_5 = arith.constant dense<0.000000e+00> : vector<2x8xf32>
    %13 = vector.multi_reduction <add>, %12, %cst_5 [2] : vector<2x8x32xf32> to vector<2x8xf32>
    %14 = vector.shape_cast %13 : vector<2x8xf32> to vector<2x8x1xf32>
    %cst_6 = arith.constant 3.200000e+01 : f32
    %15 = vector.broadcast %cst_6 : f32 to vector<2x8x1xf32>
    %16 = arith.divf %14, %15 : vector<2x8x1xf32>
    %17 = vector.broadcast %16 : vector<2x8x1xf32> to vector<2x8x32xf32>
    %18 = arith.subf %12, %17 : vector<2x8x32xf32>
    %19 = arith.mulf %18, %18 : vector<2x8x32xf32>
    %cst_7 = arith.constant dense<0.000000e+00> : vector<2x8xf32>
    %20 = vector.multi_reduction <add>, %19, %cst_7 [2] : vector<2x8x32xf32> to vector<2x8xf32>
    %21 = vector.shape_cast %20 : vector<2x8xf32> to vector<2x8x1xf32>
    %cst_8 = arith.constant 3.200000e+01 : f32
    %22 = vector.broadcast %cst_8 : f32 to vector<2x8x1xf32>
    %23 = arith.divf %21, %22 : vector<2x8x1xf32>
    %24 = vector.broadcast %16 : vector<2x8x1xf32> to vector<2x8x32xf32>
    %25 = arith.subf %12, %24 : vector<2x8x32xf32>
    %cst_9 = arith.constant 9.99999996E-13 : f32
    %26 = vector.broadcast %cst_9 : f32 to vector<2x8x1xf32>
    %27 = arith.addf %23, %26 : vector<2x8x1xf32>
    %28 = math.rsqrt %27 : vector<2x8x1xf32>
    %29 = vector.broadcast %28 : vector<2x8x1xf32> to vector<2x8x32xf32>
    %30 = arith.mulf %25, %29 : vector<2x8x32xf32>
    %c0_10 = arith.constant 0 : index
    %c0_11 = arith.constant 0 : index
    %31 = vector.load %arg3[%c0_10, %c0_11] : memref<2x32xf32, #tpu.memory_space<vmem>>, vector<2x32xf32>
    %32 = vector.extract_strided_slice %31 {offsets = [0, 0], sizes = [1, 32], strides = [1, 1]} : vector<2x32xf32> to vector<1x32xf32>
    %33 = vector.shape_cast %32 : vector<1x32xf32> to vector<1x1x32xf32>
    %34 = vector.broadcast %33 : vector<1x1x32xf32> to vector<2x8x32xf32>
    %35 = arith.mulf %30, %34 : vector<2x8x32xf32>
    %36 = vector.extract_strided_slice %31 {offsets = [1, 0], sizes = [1, 32], strides = [1, 1]} : vector<2x32xf32> to vector<1x32xf32>
    %37 = vector.shape_cast %36 : vector<1x32xf32> to vector<1x1x32xf32>
    %38 = vector.broadcast %37 : vector<1x1x32xf32> to vector<2x8x32xf32>
    %39 = arith.addf %35, %38 : vector<2x8x32xf32>
    %c0_12 = arith.constant 0 : index
    %c0_13 = arith.constant 0 : index
    %c0_14 = arith.constant 0 : index
    %40 = vector.load %arg4[%c0_12, %c0_13, %c0_14] : memref<2x8x32xf32, #tpu.memory_space<vmem>>, vector<2x8x32xf32>
    tpu.vector_store %arg4[%c0_12, %c0_13, %c0_14], %39 {strides = array<i32>} : memref<2x8x32xf32, #tpu.memory_space<vmem>>, vector<2x8x32xf32>,
    return
  }
}

</mosaic_0001>

<bundles_post_ra>
// kernel: distilbert_embeddings.1
= control target key start
LH: loop header
LB: loop body
LE: loop exit
PB: predicated region body
PF: predicated region fallthrough
CT: control target
= control target key end

     0   :  { %v276_v2 = vmov 0   ;;  %s375_s0 = inlined_call_operand.vmem [shape: s32[16,1], index: 0, kind: input, shape index: {}]   ;;  %s376_s1 = inlined_call_operand.vmem [shape: f32[128,32], index: 1, kind: input, shape index: {}]   ;;  %s377_s2 = inlined_call_operand.vmem [shape: f32[64,32], index: 2, kind: input, shape index: {}]   ;;  %s378_s3 = inlined_call_operand.vmem [shape: f32[2,32], index: 3, kind: input, shape index: {}]   ;;  %s379_s4 = inlined_call_operand.hbm [shape: f32[2,8,32], index: 4, kind: output, shape index: {}]  }
   0x1   :  { %v18_v0 = vld [vmem:[%s375_s0] sm:$0xff]  ;;  %v49_v1 = vld [vmem:[%s376_s1 + $0x78] sm:$0xff]  ;;  %249 = vset.pattern.permute.xlu0 %v276_v2  ;;  %v48_v3 = vld [vmem:[%s376_s1 + $0x70] sm:$0xff] }
   0x2   :  { %209 = vmatprep.subr.mxu0 %v49_v1  ;;  %23 = vperm.xlu0 %249, %v18_v0   ;;  %v47_v4 = vld [vmem:[%s376_s1 + $0x68] sm:$0xff]  ;;  %v46_v6 = vld [vmem:[%s376_s1 + $0x60] sm:$0xff]  ;;  %v45_v7 = vld [vmem:[%s376_s1 + $0x58] sm:$0xff] }
   0x3   :  { %210 = vmatpush3.msra.mxu0 %v49_v1  ;;  %v19_v5 = vld [vmem:[%s375_s0 + $0x8] sm:$0xff] }
   0x4   :  { %211 = vmatprep.subr.mxu0 %v48_v3 }
   0x5   :  { %212 = vmatpush3.msra.mxu0 %v48_v3 }
   0x6   :  { %213 = vmatprep.subr.mxu0 %v47_v4  ;;  %26 = vperm.xlu0 %249, %v19_v5  }
   0x7   :  { %214 = vmatpush3.msra.mxu0 %v47_v4 }
   0x8   :  { %9 = vsyncpa [#allocation3], 0  ;;  %215 = vmatprep.subr.mxu0 %v46_v6  ;;  %v44_v8 = vld [vmem:[%s376_s1 + $0x50] sm:$0xff]  ;;  %v43_v9 = vld [vmem:[%s376_s1 + $0x48] sm:$0xff]  ;;  %v20_v19 = vlaneseq  ;;  %v277_v22 = vmov 1.0   ;;  %vm128_vm2 = vcmask 261120  }
   0x9   :  { %216 = vmatpush3.msra.mxu0 %v46_v6  ;;  %v42_v10 = vld [vmem:[%s376_s1 + $0x40] sm:$0xff]  ;;  %v41_v11 = vld [vmem:[%s376_s1 + $0x38] sm:$0xff]  ;;  %v40_v12 = vld [vmem:[%s376_s1 + $0x30] sm:$0xff]  ;;  %s278_s26 = smov [#allocation2]  }
   0xa   :  { %217 = vmatprep.subr.mxu0 %v45_v7  ;;  %v39_v13 = vld [vmem:[%s376_s1 + $0x28] sm:$0xff]  ;;  %v38_v14 = vld [vmem:[%s376_s1 + $0x20] sm:$0xff]  ;;  %v37_v15 = vld [vmem:[%s376_s1 + $0x18] sm:$0xff]  ;;  %v21_v20 = vand.u32 127, %v20_v19  ;;  %v158_v47 = vshrl.u32 %v20_v19, 7  ;;  %s176_s27 = sshll.u32 %s278_s26, 4  ;;  %s177_s27 = int_to_ptr.vmem [resolvable:$true] %s176_s27 }
   0xb   :  { %218 = vmatpush3.msra.mxu0 %v45_v7  ;;  %v36_v16 = vld [vmem:[%s376_s1 + $0x10] sm:$0xff]  ;;  %v35_v17 = vld [vmem:[%s376_s1 + $0x8] sm:$0xff]  ;;  %v34_v18 = vld [vmem:[%s376_s1] sm:$0xff]  ;;  %s254_s28 = scalar_lea.vmem %s177_s27, 256  ;;  %p259_p1 = scmp.lt.s32.totalorder %s177_s27, %s177_s27 }
   0xc   :  { %219 = vmatprep.subr.mxu0 %v44_v8  ;;  %v125_v25 = vld [vmem:[%s377_s2] sm:$0xff]  ;;  %v159_v48 = vsub.s32 0, %v158_v47  ;;  %v165_v50 = vsub.s32 1, %v158_v47  ;;  %p255_p0 = scmp.ne.s32.totalorder %s177_s27, %s254_s28  ;;  %p260_p2 = scmp.lt.s32.totalorder %s254_s28, %s254_s28 }
   0xd   :  { %220 = vmatpush3.msra.mxu0 %v44_v8  ;;  %v156_v49 = vld [vmem:[%s378_s3] sm:$0x3] }
   0xe   :  { %221 = vmatprep.subr.mxu0 %v43_v9  ;;  %v160_v51 = vrot.slane %v156_v49, %v159_v48  ;;  %v166_v53 = vrot.slane %v156_v49, %v165_v50  ;;  %p261_p3 = por %p260_p2, %p259_p1 }
   0xf   :  { %222 = vmatpush3.msra.mxu0 %v43_v9 }
  0x10   :  { %223 = vmatprep.subr.mxu0 %v42_v10  ;;  %p262_p4 = pnand %p261_p3, %p255_p0 }
  0x11   :  { %224 = vmatpush3.msra.mxu0 %v42_v10 }
  0x12   :  { %225 = vmatprep.subr.mxu0 %v41_v11 }
  0x13   :  { %226 = vmatpush3.msra.mxu0 %v41_v11 }
  0x14   :  { %227 = vmatprep.subr.mxu0 %v40_v12 }
  0x15   :  { %228 = vmatpush3.msra.mxu0 %v40_v12 }
  0x16   :  { %229 = vmatprep.subr.mxu0 %v39_v13 }
  0x17   :  { %230 = vmatpush3.msra.mxu0 %v39_v13 }
  0x18   :  { %231 = vmatprep.subr.mxu0 %v38_v14 }
  0x19   :  { %232 = vmatpush3.msra.mxu0 %v38_v14 }
  0x1a   :  { %233 = vmatprep.subr.mxu0 %v37_v15 }
  0x1b   :  { %234 = vmatpush3.msra.mxu0 %v37_v15 }
  0x1c   :  { %235 = vmatprep.subr.mxu0 %v36_v16 }
  0x1d   :  { %236 = vmatpush3.msra.mxu0 %v36_v16 }
  0x1e   :  { %237 = vmatprep.subr.mxu0 %v35_v17 }
  0x1f   :  { %238 = vmatpush3.msra.mxu0 %v35_v17 }
  0x20   :  { %239 = vmatprep.subr.mxu0 %v34_v18 }
  0x21   :  { %240 = vmatpush3.msra.mxu0 %v34_v18 }
  0x7d   :  { %v24_v21 = vpop.permute.xlu0 %23 }
  0x7e   :  { %vm28_vm0 = vcmp.eq.s32.totalorder %v21_v20, %v24_v21 }
  0x7f   :  { %241 = vmatprep.mubr.msk.f32.mxu0 %vm28_vm0, %v277_v22 }
  0x81   :  { %v27_v23 = vpop.permute.xlu0 %26 }
  0x82   :  { %vm29_vm1 = vcmp.eq.s32.totalorder %v21_v20, %v27_v23 }
  0x83   :  { %242 = vmatmul.mubr.msk.f32.vlgmr.msra.gmra.mxu0 %vm29_vm1, %v277_v22 }
 0x143   :  { %v243_v24 = vpop.f32.mrf.mxu0 }
 0x144   :  { %v127_v28 = vadd.f32 %v243_v24, %v125_v25 }
 0x145   :  { %v116_v26 = vpop.f32.mrf.mxu0 }
 0x146   :  { %v126_v27 = vadd.f32 %v125_v25, %v116_v26  ;;  %v132_v30 = vsel %vm128_vm2, %v127_v28, 0.0 }
 0x148   :  { %v129_v29 = vsel %vm128_vm2, %v126_v27, 0.0 }
 0x149   :  { %130 = vadd.xlane.f32.xlu1 %v129_v29 }
 0x14d   :  { %133 = vadd.xlane.f32.xlu1 %v132_v30 }
 0x1d2   :  { %v131_v31 = vpop.xlane.xlu1 %130 }
 0x1d3   :  { %v136_v32 = vmul.f32 0.03125, %v131_v31 }
 0x1d5   :  { %v138_v33 = vsub.f32 %v126_v27, %v136_v32 }
 0x1d6   :  { %v134_v34 = vpop.xlane.xlu1 %133 }
 0x1d7   :  { %v137_v35 = vmul.f32 0.03125, %v134_v34  ;;  %v140_v36 = vmul.f32 %v138_v33, %v138_v33 }
 0x1d9   :  { %v139_v37 = vsub.f32 %v127_v28, %v137_v35  ;;  %v142_v38 = vsel %vm128_vm2, %v140_v36, 0.0 }
 0x1da   :  { %143 = vadd.xlane.f32.xlu0 %v142_v38 }
 0x1db   :  { %v141_v39 = vmul.f32 %v139_v37, %v139_v37 }
 0x1dd   :  { %v145_v40 = vsel %vm128_vm2, %v141_v39, 0.0 }
 0x1de   :  { %146 = vadd.xlane.f32.xlu1 %v145_v40 }
 0x263   :  { %v144_v41 = vpop.xlane.xlu0 %143 }
 0x264   :  { %v148_v42 = vmul.f32 0.03125, %v144_v41 }
 0x266   :  { %v150_v43 = vadd.f32 1e-12, %v148_v42 }
 0x267   :  { %v147_v44 = vpop.xlane.xlu1 %146 }
 0x268   :  { %250 = vrsqrt.f32 %v150_v43  ;;  %v149_v45 = vmul.f32 0.03125, %v147_v44 }
 0x26a   :  { %v151_v46 = vadd.f32 1e-12, %v149_v45 }
 0x26c   :  { %252 = vrsqrt.f32 %v151_v46 }
 0x275   :  { %v251_v52 = vpop.eup %250 }
 0x276   :  { %v154_v54 = vmul.f32 %v251_v52, %v138_v33 }
 0x278   :  { %v161_v55 = vmul.f32 %v160_v51, %v154_v54 }
 0x279   :  { %v253_v56 = vpop.eup %252 }
 0x27a   :  { %v155_v57 = vmul.f32 %v253_v56, %v139_v37  ;;  %v167_v58 = vadd.f32 %v166_v53, %v161_v55 }
 0x27c   :  { %v162_v59 = vmul.f32 %v160_v51, %v155_v57  ;;  %169 = vst.msk [vmem:[#allocation2] sm:$0xff] %vm128_vm2, %v167_v58 }
 0x27e   :  { %v168_v60 = vadd.f32 %v166_v53, %v162_v59 }
 0x280   :  { %170 = vst.msk [vmem:[#allocation2 + $0x8] sm:$0xff] %vm128_vm2, %v168_v60 }
 0x281   :  { %265 = shalt.err (!%p262_p4)
}
 0x282   :  { %s279_s3 = smov 128   ;;  %s280_s29 = smov 8  }
 0x283   :  { %182 = dma.vmem_to_hbm [thread:$0]  %s177_s27, 256, %s379_s4, [#allocation3], %s279_s3, %s279_s3, %s280_s29  }
 0x284   :  { %274 = dma.done.wait [#allocation3], 256  }
 0x285   :  { %275 = vsyncadd [#allocation3], 4294967040 }
 0x286   :  { %186 = vsyncpa [#allocation3], 1 }

</bundles_post_ra>
